<compile_context>
chip_gen: v6e
topology: v6e:2x2x1
jax: 0.10.0
libtpu: 0.0.40
codegen_flags: <defaults>
</compile_context>

<pallas_src>
import functools

import jax
import jax.numpy as jnp
import numpy as np
from jax.experimental import pallas as pl
from jax.experimental.pallas import tpu as pltpu


def _multi_linear_kernel(x_ref, w_ref, wmg_ref, bmg_ref, bnsc_ref, bnsh_ref,
                         bias_ref, y_ref, poly_ref, *, order, scale_const):
    c = pl.program_id(0)
    B, N, I = x_ref.shape            # (batch, nodes, c_in) for this channel
    O = y_ref.shape[-1]              # c_out

    x = x_ref[...]                   # (B, N, I)  f32

    # ---- fused shared-MLP + gate matmul, M = B*N rows on the MXU -----------------
    x2 = x.reshape(B * N, I).astype(jnp.bfloat16)
    sg = jnp.dot(x2, wmg_ref[...], preferred_element_type=jnp.float32) + bmg_ref[...]
    sg = sg.reshape(B, N, 2 * O)
    x_share = sg[:, :, :O]                       # mlp(x)   (dropout == identity, eval)
    gate = jax.nn.sigmoid(sg[:, :, O:])          # sigmoid(gate_mlp1(x))

    # ---- polynomial features, eval-mode BN folded to per-channel scalars ---------
    parts = [x]
    xp = x
    for d in range(1, order):
        xp = xp * x                                              # x ** (d + 1)
        parts.append(xp * bnsc_ref[c, d - 1] + bnsh_ref[c, d - 1])
    H = jnp.concatenate(parts, axis=-1)                          # (B, N, order*I) f32

    # ---- per-node contraction (weights differ per node): unrolled 2-D MXU dots ---
    for n in range(N):
        h_n = H[:, n, :].astype(jnp.bfloat16)                    # (B, order*I)
        poly_ref[:, n, :] = (
            jnp.dot(h_n, w_ref[n], preferred_element_type=jnp.float32)
            + bias_ref[c, n])                                    # folded res_bias/order_mlp

    # ---- gate blend at full (B, N, O) width ---------------------------------------
    x_uniq = poly_ref[...] * (scale_const / 4.0)                 # * scale / 4
    y = gate * x_uniq + (1.0 - gate) * x_share + x               # requires c_in == c_out
    y_ref[...] = y.astype(y_ref.dtype)


def multi_linear_forward(x, params, *, order):
    B, C, N, I = x.shape
    O = params["mlp_w"].shape[0]
    assert I == O, "residual `+ x` in Multi_Linear.forward requires c_in == c_out"
    K = order * I
    scale_const = float(O) / (order * I)
    n_bn = max(order - 1, 1)

    # fold order_mlp (Linear(order, 1)) into the per-order weights / per-(c,n) bias
    w_om = params["order_w"][0]                                   # (order,)
    b_om = params["order_b"][0]                                   # ()
    w_eff = (jnp.transpose(params["res_weight"], (0, 1, 4, 2, 3)) # (C, N, order, I, O)
             * w_om[None, None, :, None, None])
    w_eff = w_eff.reshape(C, N, K, O).astype(jnp.bfloat16)        # (C, N, order*I, O)
    bias_cn = (params["res_bias"][0, :, :, 0, 0] * jnp.sum(w_om) + b_om
               ).astype(jnp.float32)                              # (C, N)

    # eval-mode BatchNorm2d -> per-channel scalar scale / shift (SMEM tables)
    if order > 1:
        sc = params["bn_gamma"] / jnp.sqrt(params["bn_var"] + 1e-5)   # (order-1, C)
        sh = params["bn_beta"] - params["bn_mean"] * sc
        bn_sc = sc.T.astype(jnp.float32)                          # (C, order-1)
        bn_sh = sh.T.astype(jnp.float32)
    else:
        bn_sc = jnp.zeros((C, n_bn), jnp.float32)
        bn_sh = jnp.zeros((C, n_bn), jnp.float32)

    # fuse shared-MLP and gate matmuls into one (I, 2*O) weight
    wmg = jnp.concatenate([params["mlp_w"].T, params["gate1_w"].T],
                          axis=1).astype(jnp.bfloat16)            # (I, 2O)
    bmg = jnp.concatenate([params["mlp_b"], params["gate1_b"]]
                          )[None, :].astype(jnp.float32)          # (1, 2O)

    kernel = functools.partial(_multi_linear_kernel, order=order,
                               scale_const=scale_const)

    y = pl.pallas_call(
        kernel,
        out_shape=jax.ShapeDtypeStruct((B, C, N, O), jnp.float32),
        grid=(C,),
        in_specs=[
            pl.BlockSpec((B, None, N, I), lambda c: (0, c, 0, 0)),    # x (native layout)
            pl.BlockSpec((None, N, K, O), lambda c: (c, 0, 0, 0)),    # folded res_weight (bf16)
            pl.BlockSpec((I, 2 * O), lambda c: (0, 0)),               # fused mlp+gate weight
            pl.BlockSpec((1, 2 * O), lambda c: (0, 0)),               # fused mlp+gate bias
            pl.BlockSpec(memory_space=pltpu.MemorySpace.SMEM),        # BN scale  (C, order-1)
            pl.BlockSpec(memory_space=pltpu.MemorySpace.SMEM),        # BN shift  (C, order-1)
            pl.BlockSpec(memory_space=pltpu.MemorySpace.SMEM),        # folded res_bias (C, N)
        ],
        out_specs=pl.BlockSpec((B, None, N, O), lambda c: (0, c, 0, 0)),
        scratch_shapes=[pltpu.VMEM((B, N, O), jnp.float32)],          # per-node poly results
        compiler_params=pltpu.CompilerParams(
            dimension_semantics=("parallel",)),
        # TODO(synk): at production sizes re-derive block shapes against v7x's 64 MiB VMEM
        # and raise vmem_limit_bytes explicitly; at these shapes defaults are ample.
    )(x.astype(jnp.float32), w_eff, wmg, bmg, bn_sc, bn_sh, bias_cn)

    return y                                                       # (B, C, N, O)


def reference_forward(x, params, *, order):
    """Pure-JAX mirror of the PyTorch forward (eval mode), f32 throughout."""
    B, C, N, I = x.shape
    O = params["mlp_w"].shape[0]
    scale_const = float(O) / (order * I)
    x_share = x @ params["mlp_w"].T + params["mlp_b"]             # dropout == identity
    h = [x[..., None]]
    x0 = x
    for i in range(1, order):
        x0 = x0 * x
        sc = params["bn_gamma"][i - 1] / jnp.sqrt(params["bn_var"][i - 1] + 1e-5)
        sh = params["bn_beta"][i - 1] - params["bn_mean"][i - 1] * sc
        x1 = x0 * sc[None, :, None, None] + sh[None, :, None, None]
        h.append(x1[..., None])
    h = jnp.concatenate(h, axis=-1)                               # (B, C, N, I, order)
    x_uniq = jnp.einsum('BCNID,CNIOD->BCNOD', h, params["res_weight"]) + params["res_bias"]
    x_uniq = (x_uniq @ params["order_w"].T + params["order_b"])[..., 0]
    x_uniq = x_uniq * scale_const / 4.0
    gate = jax.nn.sigmoid(x @ params["gate1_w"].T + params["gate1_b"])
    return gate * x_uniq + (1.0 - gate) * x_share + x


if __name__ == "__main__":
    B, C, N, I, O, ORDER = 2, 4, 8, 32, 32, 2   # batch, channels, nodes, c_in, c_out, order

    key = jax.random.PRNGKey(0)
    ks = jax.random.split(key, 12)
    params = {
        "res_weight": 0.1 * jax.random.normal(ks[0], (C, N, I, O, ORDER), jnp.float32),
        "res_bias":   0.1 * jax.random.normal(ks[1], (1, C, N, 1, 1), jnp.float32),
        "order_w":    0.1 * jax.random.normal(ks[2], (1, ORDER), jnp.float32),
        "order_b":    0.1 * jax.random.normal(ks[3], (1,), jnp.float32),
        "mlp_w":      0.1 * jax.random.normal(ks[4], (O, I), jnp.float32),
        "mlp_b":      0.1 * jax.random.normal(ks[5], (O,), jnp.float32),
        "gate1_w":    0.1 * jax.random.normal(ks[6], (O, I), jnp.float32),
        "gate1_b":    0.1 * jax.random.normal(ks[7], (O,), jnp.float32),
        # gate_mlp2 is defined in __init__ but never used in forward -> omitted.
        # BatchNorm2d (one layer per extra order), eval-mode running stats:
        "bn_gamma": jnp.ones((ORDER - 1, C), jnp.float32)
                    + 0.1 * jax.random.normal(ks[8], (ORDER - 1, C), jnp.float32),
        "bn_beta":  0.1 * jax.random.normal(ks[9], (ORDER - 1, C), jnp.float32),
        "bn_mean":  jnp.zeros((ORDER - 1, C), jnp.float32),
        "bn_var":   jnp.ones((ORDER - 1, C), jnp.float32),
    }
    x = jax.random.normal(ks[10], (B, C, N, I), jnp.float32)

    y = multi_linear_forward(x, params, order=ORDER)
    y = jax.block_until_ready(y)

    y_ref = reference_forward(x, params, order=ORDER)
    np.testing.assert_allclose(np.asarray(y), np.asarray(y_ref), rtol=2e-2, atol=2e-2)
    print("KERNEL_OK")
</pallas_src>

<mosaic_0001>
module attributes {stable_mosaic.version = 11 : i64} {
  func.func @_multi_linear_kernel(%arg0: i32, %arg1: memref<2x1x8x32xf32, #tpu.memory_space<vmem>>, %arg2: memref<1x8x64x32xbf16, #tpu.memory_space<vmem>>, %arg3: memref<32x64xbf16, #tpu.memory_space<vmem>>, %arg4: memref<1x64xf32, #tpu.memory_space<vmem>>, %arg5: memref<4x1xf32, #tpu.memory_space<smem>>, %arg6: memref<4x1xf32, #tpu.memory_space<smem>>, %arg7: memref<4x8xf32, #tpu.memory_space<smem>>, %arg8: memref<2x1x8x32xf32, #tpu.memory_space<vmem>>, %arg9: memref<2x8x32xf32, #tpu.memory_space<vmem>>) attributes {dimension_semantics = [#tpu.dimension_semantics<parallel>], iteration_bounds = array<i64: 4>, scalar_prefetch = 0 : i64, scratch_operands = 1 : i64, tpu.core_type = #tpu.core_type<tc>, window_params = [{transform_indices = @transform_0, window_bounds = array<i64: 2, 1, 8, 32>}, {transform_indices = @transform_1, window_bounds = array<i64: 1, 8, 64, 32>}, {pipeline_mode = #tpu.pipeline_mode<synchronous>, transform_indices = @transform_2, window_bounds = array<i64: 32, 64>}, {pipeline_mode = #tpu.pipeline_mode<synchronous>, transform_indices = @transform_3, window_bounds = array<i64: 1, 64>}, {transform_indices = @transform_4, window_bounds = array<i64: 4, 1>}, {transform_indices = @transform_5, window_bounds = array<i64: 4, 1>}, {transform_indices = @transform_6, window_bounds = array<i64: 4, 8>}, {transform_indices = @transform_7, window_bounds = array<i64: 2, 1, 8, 32>}]} {
    %c0 = arith.constant 0 : index
    %c0_0 = arith.constant 0 : index
    %c0_1 = arith.constant 0 : index
    %c0_2 = arith.constant 0 : index
    %0 = vector.load %arg1[%c0, %c0_0, %c0_1, %c0_2] : memref<2x1x8x32xf32, #tpu.memory_space<vmem>>, vector<2x1x8x32xf32>
    %1 = vector.shape_cast %0 : vector<2x1x8x32xf32> to vector<2x8x32xf32>
    %2 = vector.shape_cast %1 : vector<2x8x32xf32> to vector<16x32xf32>
    %3 = arith.truncf %2 : vector<16x32xf32> to vector<16x32xbf16>
    %c0_3 = arith.constant 0 : index
    %c0_4 = arith.constant 0 : index
    %4 = vector.load %arg3[%c0_3, %c0_4] : memref<32x64xbf16, #tpu.memory_space<vmem>>, vector<32x64xbf16>
    %cst = arith.constant dense<0.000000e+00> : vector<16x64xf32>
    %5 = tpu.matmul %3, %4, %cst {dimension_numbers = #tpu.dot_dimension_numbers<[1], [0], [0], [1], [0, 0, 1, 1], [], []>} : vector<16x32xbf16>, vector<32x64xbf16>, vector<16x64xf32> -> vector<16x64xf32>
    %c0_5 = arith.constant 0 : index
    %c0_6 = arith.constant 0 : index
    %6 = vector.load %arg4[%c0_5, %c0_6] : memref<1x64xf32, #tpu.memory_space<vmem>>, vector<1x64xf32>
    %7 = vector.broadcast %6 : vector<1x64xf32> to vector<16x64xf32>
    %8 = arith.addf %5, %7 : vector<16x64xf32>
    %9 = vector.shape_cast %8 : vector<16x64xf32> to vector<2x8x64xf32>
    %10 = vector.extract_strided_slice %9 {offsets = [0, 0, 0], sizes = [2, 8, 32], strides = [1, 1, 1]} : vector<2x8x64xf32> to vector<2x8x32xf32>
    %11 = vector.extract_strided_slice %9 {offsets = [0, 0, 32], sizes = [2, 8, 32], strides = [1, 1, 1]} : vector<2x8x64xf32> to vector<2x8x32xf32>
    %12 = arith.negf %11 : vector<2x8x32xf32>
    %13 = math.exp %12 : vector<2x8x32xf32>
    %cst_7 = arith.constant 1.000000e+00 : f32
    %14 = vector.broadcast %cst_7 : f32 to vector<2x8x32xf32>
    %15 = arith.addf %14, %13 : vector<2x8x32xf32>
    %16 = arith.divf %14, %15 : vector<2x8x32xf32>
    %17 = arith.mulf %1, %1 : vector<2x8x32xf32>
    %18 = arith.index_cast %arg0 : i32 to index
    %c0_8 = arith.constant 0 : index
    %19 = memref.load %arg5[%18, %c0_8] : memref<4x1xf32, #tpu.memory_space<smem>>
    %20 = vector.broadcast %19 : f32 to vector<2x8x32xf32>
    %21 = arith.mulf %17, %20 : vector<2x8x32xf32>
    %22 = arith.index_cast %arg0 : i32 to index
    %c0_9 = arith.constant 0 : index
    %23 = memref.load %arg6[%22, %c0_9] : memref<4x1xf32, #tpu.memory_space<smem>>
    %24 = vector.broadcast %23 : f32 to vector<2x8x32xf32>
    %25 = arith.addf %21, %24 : vector<2x8x32xf32>
    %26 = tpu.concatenate %1, %25 in 2 : vector<2x8x32xf32>, vector<2x8x32xf32> -> vector<2x8x64xf32>
    %27 = vector.extract_strided_slice %26 {offsets = [0, 0, 0], sizes = [2, 1, 64], strides = [1, 1, 1]} : vector<2x8x64xf32> to vector<2x1x64xf32>
    %28 = vector.shape_cast %27 : vector<2x1x64xf32> to vector<2x64xf32>
    %29 = arith.truncf %28 : vector<2x64xf32> to vector<2x64xbf16>
    %c0_10 = arith.constant 0 : index
    %c0_11 = arith.constant 0 : index
    %c0_12 = arith.constant 0 : index
    %c0_13 = arith.constant 0 : index
    %30 = vector.load %arg2[%c0_10, %c0_11, %c0_12, %c0_13] : memref<1x8x64x32xbf16, #tpu.memory_space<vmem>>, vector<1x1x64x32xbf16>
    %31 = vector.shape_cast %30 : vector<1x1x64x32xbf16> to vector<64x32xbf16>
    %cst_14 = arith.constant dense<0.000000e+00> : vector<2x32xf32>
    %32 = tpu.matmul %29, %31, %cst_14 {dimension_numbers = #tpu.dot_dimension_numbers<[1], [0], [0], [1], [0, 0, 1, 1], [], []>} : vector<2x64xbf16>, vector<64x32xbf16>, vector<2x32xf32> -> vector<2x32xf32>
    %33 = arith.index_cast %arg0 : i32 to index
    %c0_15 = arith.constant 0 : index
    %34 = memref.load %arg7[%33, %c0_15] : memref<4x8xf32, #tpu.memory_space<smem>>
    %35 = vector.broadcast %34 : f32 to vector<2x32xf32>
    %36 = arith.addf %32, %35 : vector<2x32xf32>
    %c0_16 = arith.constant 0 : index
    %c0_17 = arith.constant 0 : index
    %c0_18 = arith.constant 0 : index
    %37 = vector.load %arg9[%c0_16, %c0_17, %c0_18] : memref<2x8x32xf32, #tpu.memory_space<vmem>>, vector<2x1x32xf32>
    %38 = vector.shape_cast %37 : vector<2x1x32xf32> to vector<2x32xf32>
    %39 = vector.shape_cast %36 : vector<2x32xf32> to vector<2x1x32xf32>
    tpu.vector_store %arg9[%c0_16, %c0_17, %c0_18], %39 {strides = array<i32>} : memref<2x8x32xf32, #tpu.memory_space<vmem>>, vector<2x1x32xf32>,
    %40 = vector.extract_strided_slice %26 {offsets = [0, 1, 0], sizes = [2, 1, 64], strides = [1, 1, 1]} : vector<2x8x64xf32> to vector<2x1x64xf32>
    %41 = vector.shape_cast %40 : vector<2x1x64xf32> to vector<2x64xf32>
    %42 = arith.truncf %41 : vector<2x64xf32> to vector<2x64xbf16>
    %c0_19 = arith.constant 0 : index
    %c1 = arith.constant 1 : index
    %c0_20 = arith.constant 0 : index
    %c0_21 = arith.constant 0 : index
    %43 = vector.load %arg2[%c0_19, %c1, %c0_20, %c0_21] : memref<1x8x64x32xbf16, #tpu.memory_space<vmem>>, vector<1x1x64x32xbf16>
    %44 = vector.shape_cast %43 : vector<1x1x64x32xbf16> to vector<64x32xbf16>
    %cst_22 = arith.constant dense<0.000000e+00> : vector<2x32xf32>
    %45 = tpu.matmul %42, %44, %cst_22 {dimension_numbers = #tpu.dot_dimension_numbers<[1], [0], [0], [1], [0, 0, 1, 1], [], []>} : vector<2x64xbf16>, vector<64x32xbf16>, vector<2x32xf32> -> vector<2x32xf32>
    %46 = arith.index_cast %arg0 : i32 to index
    %c1_23 = arith.constant 1 : index
    %47 = memref.load %arg7[%46, %c1_23] : memref<4x8xf32, #tpu.memory_space<smem>>
    %48 = vector.broadcast %47 : f32 to vector<2x32xf32>
    %49 = arith.addf %45, %48 : vector<2x32xf32>
    %c0_24 = arith.constant 0 : index
    %c1_25 = arith.constant 1 : index
    %c0_26 = arith.constant 0 : index
    %50 = vector.load %arg9[%c0_24, %c1_25, %c0_26] : memref<2x8x32xf32, #tpu.memory_space<vmem>>, vector<2x1x32xf32>
    %51 = vector.shape_cast %50 : vector<2x1x32xf32> to vector<2x32xf32>
    %52 = vector.shape_cast %49 : vector<2x32xf32> to vector<2x1x32xf32>
    tpu.vector_store %arg9[%c0_24, %c1_25, %c0_26], %52 {strides = array<i32>} : memref<2x8x32xf32, #tpu.memory_space<vmem>>, vector<2x1x32xf32>,
    %53 = vector.extract_strided_slice %26 {offsets = [0, 2, 0], sizes = [2, 1, 64], strides = [1, 1, 1]} : vector<2x8x64xf32> to vector<2x1x64xf32>
    %54 = vector.shape_cast %53 : vector<2x1x64xf32> to vector<2x64xf32>
    %55 = arith.truncf %54 : vector<2x64xf32> to vector<2x64xbf16>
    %c0_27 = arith.constant 0 : index
    %c2 = arith.constant 2 : index
    %c0_28 = arith.constant 0 : index
    %c0_29 = arith.constant 0 : index
    %56 = vector.load %arg2[%c0_27, %c2, %c0_28, %c0_29] : memref<1x8x64x32xbf16, #tpu.memory_space<vmem>>, vector<1x1x64x32xbf16>
    %57 = vector.shape_cast %56 : vector<1x1x64x32xbf16> to vector<64x32xbf16>
    %cst_30 = arith.constant dense<0.000000e+00> : vector<2x32xf32>
    %58 = tpu.matmul %55, %57, %cst_30 {dimension_numbers = #tpu.dot_dimension_numbers<[1], [0], [0], [1], [0, 0, 1, 1], [], []>} : vector<2x64xbf16>, vector<64x32xbf16>, vector<2x32xf32> -> vector<2x32xf32>
    %59 = arith.index_cast %arg0 : i32 to index
    %c2_31 = arith.constant 2 : index
    %60 = memref.load %arg7[%59, %c2_31] : memref<4x8xf32, #tpu.memory_space<smem>>
    %61 = vector.broadcast %60 : f32 to vector<2x32xf32>
    %62 = arith.addf %58, %61 : vector<2x32xf32>
    %c0_32 = arith.constant 0 : index
    %c2_33 = arith.constant 2 : index
    %c0_34 = arith.constant 0 : index
    %63 = vector.load %arg9[%c0_32, %c2_33, %c0_34] : memref<2x8x32xf32, #tpu.memory_space<vmem>>, vector<2x1x32xf32>
    %64 = vector.shape_cast %63 : vector<2x1x32xf32> to vector<2x32xf32>
    %65 = vector.shape_cast %62 : vector<2x32xf32> to vector<2x1x32xf32>
    tpu.vector_store %arg9[%c0_32, %c2_33, %c0_34], %65 {strides = array<i32>} : memref<2x8x32xf32, #tpu.memory_space<vmem>>, vector<2x1x32xf32>,
    %66 = vector.extract_strided_slice %26 {offsets = [0, 3, 0], sizes = [2, 1, 64], strides = [1, 1, 1]} : vector<2x8x64xf32> to vector<2x1x64xf32>
    %67 = vector.shape_cast %66 : vector<2x1x64xf32> to vector<2x64xf32>
    %68 = arith.truncf %67 : vector<2x64xf32> to vector<2x64xbf16>
    %c0_35 = arith.constant 0 : index
    %c3 = arith.constant 3 : index
    %c0_36 = arith.constant 0 : index
    %c0_37 = arith.constant 0 : index
    %69 = vector.load %arg2[%c0_35, %c3, %c0_36, %c0_37] : memref<1x8x64x32xbf16, #tpu.memory_space<vmem>>, vector<1x1x64x32xbf16>
    %70 = vector.shape_cast %69 : vector<1x1x64x32xbf16> to vector<64x32xbf16>
    %cst_38 = arith.constant dense<0.000000e+00> : vector<2x32xf32>
    %71 = tpu.matmul %68, %70, %cst_38 {dimension_numbers = #tpu.dot_dimension_numbers<[1], [0], [0], [1], [0, 0, 1, 1], [], []>} : vector<2x64xbf16>, vector<64x32xbf16>, vector<2x32xf32> -> vector<2x32xf32>
    %72 = arith.index_cast %arg0 : i32 to index
    %c3_39 = arith.constant 3 : index
    %73 = memref.load %arg7[%72, %c3_39] : memref<4x8xf32, #tpu.memory_space<smem>>
    %74 = vector.broadcast %73 : f32 to vector<2x32xf32>
    %75 = arith.addf %71, %74 : vector<2x32xf32>
    %c0_40 = arith.constant 0 : index
    %c3_41 = arith.constant 3 : index
    %c0_42 = arith.constant 0 : index
    %76 = vector.load %arg9[%c0_40, %c3_41, %c0_42] : memref<2x8x32xf32, #tpu.memory_space<vmem>>, vector<2x1x32xf32>
    %77 = vector.shape_cast %76 : vector<2x1x32xf32> to vector<2x32xf32>
    %78 = vector.shape_cast %75 : vector<2x32xf32> to vector<2x1x32xf32>
    tpu.vector_store %arg9[%c0_40, %c3_41, %c0_42], %78 {strides = array<i32>} : memref<2x8x32xf32, #tpu.memory_space<vmem>>, vector<2x1x32xf32>,
    %79 = vector.extract_strided_slice %26 {offsets = [0, 4, 0], sizes = [2, 1, 64], strides = [1, 1, 1]} : vector<2x8x64xf32> to vector<2x1x64xf32>
    %80 = vector.shape_cast %79 : vector<2x1x64xf32> to vector<2x64xf32>
    %81 = arith.truncf %80 : vector<2x64xf32> to vector<2x64xbf16>
    %c0_43 = arith.constant 0 : index
    %c4 = arith.constant 4 : index
    %c0_44 = arith.constant 0 : index
    %c0_45 = arith.constant 0 : index
    %82 = vector.load %arg2[%c0_43, %c4, %c0_44, %c0_45] : memref<1x8x64x32xbf16, #tpu.memory_space<vmem>>, vector<1x1x64x32xbf16>
    %83 = vector.shape_cast %82 : vector<1x1x64x32xbf16> to vector<64x32xbf16>
    %cst_46 = arith.constant dense<0.000000e+00> : vector<2x32xf32>
    %84 = tpu.matmul %81, %83, %cst_46 {dimension_numbers = #tpu.dot_dimension_numbers<[1], [0], [0], [1], [0, 0, 1, 1], [], []>} : vector<2x64xbf16>, vector<64x32xbf16>, vector<2x32xf32> -> vector<2x32xf32>
    %85 = arith.index_cast %arg0 : i32 to index
    %c4_47 = arith.constant 4 : index
    %86 = memref.load %arg7[%85, %c4_47] : memref<4x8xf32, #tpu.memory_space<smem>>
    %87 = vector.broadcast %86 : f32 to vector<2x32xf32>
    %88 = arith.addf %84, %87 : vector<2x32xf32>
    %c0_48 = arith.constant 0 : index
    %c4_49 = arith.constant 4 : index
    %c0_50 = arith.constant 0 : index
    %89 = vector.load %arg9[%c0_48, %c4_49, %c0_50] : memref<2x8x32xf32, #tpu.memory_space<vmem>>, vector<2x1x32xf32>
    %90 = vector.shape_cast %89 : vector<2x1x32xf32> to vector<2x32xf32>
    %91 = vector.shape_cast %88 : vector<2x32xf32> to vector<2x1x32xf32>
    tpu.vector_store %arg9[%c0_48, %c4_49, %c0_50], %91 {strides = array<i32>} : memref<2x8x32xf32, #tpu.memory_space<vmem>>, vector<2x1x32xf32>,
    %92 = vector.extract_strided_slice %26 {offsets = [0, 5, 0], sizes = [2, 1, 64], strides = [1, 1, 1]} : vector<2x8x64xf32> to vector<2x1x64xf32>
    %93 = vector.shape_cast %92 : vector<2x1x64xf32> to vector<2x64xf32>
    %94 = arith.truncf %93 : vector<2x64xf32> to vector<2x64xbf16>
    %c0_51 = arith.constant 0 : index
    %c5 = arith.constant 5 : index
    %c0_52 = arith.constant 0 : index
    %c0_53 = arith.constant 0 : index
    %95 = vector.load %arg2[%c0_51, %c5, %c0_52, %c0_53] : memref<1x8x64x32xbf16, #tpu.memory_space<vmem>>, vector<1x1x64x32xbf16>
    %96 = vector.shape_cast %95 : vector<1x1x64x32xbf16> to vector<64x32xbf16>
    %cst_54 = arith.constant dense<0.000000e+00> : vector<2x32xf32>
    %97 = tpu.matmul %94, %96, %cst_54 {dimension_numbers = #tpu.dot_dimension_numbers<[1], [0], [0], [1], [0, 0, 1, 1], [], []>} : vector<2x64xbf16>, vector<64x32xbf16>, vector<2x32xf32> -> vector<2x32xf32>
    %98 = arith.index_cast %arg0 : i32 to index
    %c5_55 = arith.constant 5 : index
    %99 = memref.load %arg7[%98, %c5_55] : memref<4x8xf32, #tpu.memory_space<smem>>
    %100 = vector.broadcast %99 : f32 to vector<2x32xf32>
    %101 = arith.addf %97, %100 : vector<2x32xf32>
    %c0_56 = arith.constant 0 : index
    %c5_57 = arith.constant 5 : index
    %c0_58 = arith.constant 0 : index
    %102 = vector.load %arg9[%c0_56, %c5_57, %c0_58] : memref<2x8x32xf32, #tpu.memory_space<vmem>>, vector<2x1x32xf32>
    %103 = vector.shape_cast %102 : vector<2x1x32xf32> to vector<2x32xf32>
    %104 = vector.shape_cast %101 : vector<2x32xf32> to vector<2x1x32xf32>
    tpu.vector_store %arg9[%c0_56, %c5_57, %c0_58], %104 {strides = array<i32>} : memref<2x8x32xf32, #tpu.memory_space<vmem>>, vector<2x1x32xf32>,
    %105 = vector.extract_strided_slice %26 {offsets = [0, 6, 0], sizes = [2, 1, 64], strides = [1, 1, 1]} : vector<2x8x64xf32> to vector<2x1x64xf32>
    %106 = vector.shape_cast %105 : vector<2x1x64xf32> to vector<2x64xf32>
    %107 = arith.truncf %106 : vector<2x64xf32> to vector<2x64xbf16>
    %c0_59 = arith.constant 0 : index
    %c6 = arith.constant 6 : index
    %c0_60 = arith.constant 0 : index
    %c0_61 = arith.constant 0 : index
    %108 = vector.load %arg2[%c0_59, %c6, %c0_60, %c0_61] : memref<1x8x64x32xbf16, #tpu.memory_space<vmem>>, vector<1x1x64x32xbf16>
    %109 = vector.shape_cast %108 : vector<1x1x64x32xbf16> to vector<64x32xbf16>
    %cst_62 = arith.constant dense<0.000000e+00> : vector<2x32xf32>
    %110 = tpu.matmul %107, %109, %cst_62 {dimension_numbers = #tpu.dot_dimension_numbers<[1], [0], [0], [1], [0, 0, 1, 1], [], []>} : vector<2x64xbf16>, vector<64x32xbf16>, vector<2x32xf32> -> vector<2x32xf32>
    %111 = arith.index_cast %arg0 : i32 to index
    %c6_63 = arith.constant 6 : index
    %112 = memref.load %arg7[%111, %c6_63] : memref<4x8xf32, #tpu.memory_space<smem>>
    %113 = vector.broadcast %112 : f32 to vector<2x32xf32>
    %114 = arith.addf %110, %113 : vector<2x32xf32>
    %c0_64 = arith.constant 0 : index
    %c6_65 = arith.constant 6 : index
    %c0_66 = arith.constant 0 : index
    %115 = vector.load %arg9[%c0_64, %c6_65, %c0_66] : memref<2x8x32xf32, #tpu.memory_space<vmem>>, vector<2x1x32xf32>
    %116 = vector.shape_cast %115 : vector<2x1x32xf32> to vector<2x32xf32>
    %117 = vector.shape_cast %114 : vector<2x32xf32> to vector<2x1x32xf32>
    tpu.vector_store %arg9[%c0_64, %c6_65, %c0_66], %117 {strides = array<i32>} : memref<2x8x32xf32, #tpu.memory_space<vmem>>, vector<2x1x32xf32>,
    %118 = vector.extract_strided_slice %26 {offsets = [0, 7, 0], sizes = [2, 1, 64], strides = [1, 1, 1]} : vector<2x8x64xf32> to vector<2x1x64xf32>
    %119 = vector.shape_cast %118 : vector<2x1x64xf32> to vector<2x64xf32>
    %120 = arith.truncf %119 : vector<2x64xf32> to vector<2x64xbf16>
    %c0_67 = arith.constant 0 : index
    %c7 = arith.constant 7 : index
    %c0_68 = arith.constant 0 : index
    %c0_69 = arith.constant 0 : index
    %121 = vector.load %arg2[%c0_67, %c7, %c0_68, %c0_69] : memref<1x8x64x32xbf16, #tpu.memory_space<vmem>>, vector<1x1x64x32xbf16>
    %122 = vector.shape_cast %121 : vector<1x1x64x32xbf16> to vector<64x32xbf16>
    %cst_70 = arith.constant dense<0.000000e+00> : vector<2x32xf32>
    %123 = tpu.matmul %120, %122, %cst_70 {dimension_numbers = #tpu.dot_dimension_numbers<[1], [0], [0], [1], [0, 0, 1, 1], [], []>} : vector<2x64xbf16>, vector<64x32xbf16>, vector<2x32xf32> -> vector<2x32xf32>
    %124 = arith.index_cast %arg0 : i32 to index
    %c7_71 = arith.constant 7 : index
    %125 = memref.load %arg7[%124, %c7_71] : memref<4x8xf32, #tpu.memory_space<smem>>
    %126 = vector.broadcast %125 : f32 to vector<2x32xf32>
    %127 = arith.addf %123, %126 : vector<2x32xf32>
    %c0_72 = arith.constant 0 : index
    %c7_73 = arith.constant 7 : index
    %c0_74 = arith.constant 0 : index
    %128 = vector.load %arg9[%c0_72, %c7_73, %c0_74] : memref<2x8x32xf32, #tpu.memory_space<vmem>>, vector<2x1x32xf32>
    %129 = vector.shape_cast %128 : vector<2x1x32xf32> to vector<2x32xf32>
    %130 = vector.shape_cast %127 : vector<2x32xf32> to vector<2x1x32xf32>
    tpu.vector_store %arg9[%c0_72, %c7_73, %c0_74], %130 {strides = array<i32>} : memref<2x8x32xf32, #tpu.memory_space<vmem>>, vector<2x1x32xf32>,
    %c0_75 = arith.constant 0 : index
    %c0_76 = arith.constant 0 : index
    %c0_77 = arith.constant 0 : index
    %131 = vector.load %arg9[%c0_75, %c0_76, %c0_77] : memref<2x8x32xf32, #tpu.memory_space<vmem>>, vector<2x8x32xf32>
    %cst_78 = arith.constant 1.250000e-01 : f32
    %132 = vector.broadcast %cst_78 : f32 to vector<2x8x32xf32>
    %133 = arith.mulf %131, %132 : vector<2x8x32xf32>
    %134 = arith.mulf %16, %133 : vector<2x8x32xf32>
    %cst_79 = arith.constant 1.000000e+00 : f32
    %135 = vector.broadcast %cst_79 : f32 to vector<2x8x32xf32>
    %136 = arith.subf %135, %16 : vector<2x8x32xf32>
    %137 = arith.mulf %136, %10 : vector<2x8x32xf32>
    %138 = arith.addf %134, %137 : vector<2x8x32xf32>
    %139 = arith.addf %138, %1 : vector<2x8x32xf32>
    %c0_80 = arith.constant 0 : index
    %c0_81 = arith.constant 0 : index
    %c0_82 = arith.constant 0 : index
    %c0_83 = arith.constant 0 : index
    %140 = vector.load %arg8[%c0_80, %c0_81, %c0_82, %c0_83] : memref<2x1x8x32xf32, #tpu.memory_space<vmem>>, vector<2x1x8x32xf32>
    %141 = vector.shape_cast %140 : vector<2x1x8x32xf32> to vector<2x8x32xf32>
    %142 = vector.shape_cast %139 : vector<2x8x32xf32> to vector<2x1x8x32xf32>
    tpu.vector_store %arg8[%c0_80, %c0_81, %c0_82, %c0_83], %142 {strides = array<i32>} : memref<2x1x8x32xf32, #tpu.memory_space<vmem>>, vector<2x1x8x32xf32>,
    return
  }
  func.func @transform_0(%arg0: i32) -> (i32, i32, i32, i32) {
    %c0_i32 = arith.constant 0 : i32
    %c0_i32_0 = arith.constant 0 : i32
    %c0_i32_1 = arith.constant 0 : i32
    %c0_i32_2 = arith.constant 0 : i32
    return %c0_i32, %arg0, %c0_i32_0, %c0_i32_1 : i32, i32, i32, i32
  }
  func.func @transform_1(%arg0: i32) -> (i32, i32, i32, i32) {
    %c0_i32 = arith.constant 0 : i32
    %c0_i32_0 = arith.constant 0 : i32
    %c0_i32_1 = arith.constant 0 : i32
    %c0_i32_2 = arith.constant 0 : i32
    return %arg0, %c0_i32, %c0_i32_0, %c0_i32_1 : i32, i32, i32, i32
  }
  func.func @transform_2(%arg0: i32) -> (i32, i32) {
    %c0_i32 = arith.constant 0 : i32
    %c0_i32_0 = arith.constant 0 : i32
    %c0_i32_1 = arith.constant 0 : i32
    return %c0_i32, %c0_i32_0 : i32, i32
  }
  func.func @transform_3(%arg0: i32) -> (i32, i32) {
    %c0_i32 = arith.constant 0 : i32
    %c0_i32_0 = arith.constant 0 : i32
    %c0_i32_1 = arith.constant 0 : i32
    return %c0_i32, %c0_i32_0 : i32, i32
  }
  func.func @transform_4(%arg0: i32) -> (i32, i32) {
    %c0_i32 = arith.constant 0 : i32
    %c0_i32_0 = arith.constant 0 : i32
    %c0_i32_1 = arith.constant 0 : i32
    return %c0_i32, %c0_i32_0 : i32, i32
  }
  func.func @transform_5(%arg0: i32) -> (i32, i32) {
    %c0_i32 = arith.constant 0 : i32
    %c0_i32_0 = arith.constant 0 : i32
    %c0_i32_1 = arith.constant 0 : i32
    return %c0_i32, %c0_i32_0 : i32, i32
  }
  func.func @transform_6(%arg0: i32) -> (i32, i32) {
    %c0_i32 = arith.constant 0 : i32
    %c0_i32_0 = arith.constant 0 : i32
    %c0_i32_1 = arith.constant 0 : i32
    return %c0_i32, %c0_i32_0 : i32, i32
  }
  func.func @transform_7(%arg0: i32) -> (i32, i32, i32, i32) {
    %c0_i32 = arith.constant 0 : i32
    %c0_i32_0 = arith.constant 0 : i32
    %c0_i32_1 = arith.constant 0 : i32
    %c0_i32_2 = arith.constant 0 : i32
    return %c0_i32, %arg0, %c0_i32_0, %c0_i32_1 : i32, i32, i32, i32
  }
}

</mosaic_0001>

<bundles_post_ra>
// kernel: tpu_custom_call.1
= control target key start
LH: loop header
LB: loop body
LE: loop exit
PB: predicated region body
PF: predicated region fallthrough
CT: control target
= control target key end

     0   :  { %12 = vsyncpa [#allocation6], 0  ;;  %s2499_s0 = inlined_call_operand.vmem [shape: f32[2,4,8,32], index: 0, kind: input, shape index: {}]   ;;  %s2500_s1 = inlined_call_operand.vmem [shape: bf16[4,8,64,32], index: 1, kind: input, shape index: {}]   ;;  %s2501_s2 = inlined_call_operand.vmem [shape: bf16[32,64], index: 2, kind: input, shape index: {}]   ;;  %s2502_s3 = inlined_call_operand.vmem [shape: f32[1,64], index: 3, kind: input, shape index: {}]   ;;  %s2503_s4 = inlined_call_operand.vmem [shape: f32[4,1], index: 4, kind: input, shape index: {}]   ;;  %s2504_s5 = inlined_call_operand.vmem [shape: f32[4,1], index: 5, kind: input, shape index: {}]   ;;  %s2505_s6 = inlined_call_operand.vmem [shape: f32[4,8], index: 6, kind: input, shape index: {}]   ;;  %s2506_s7 = inlined_call_operand.hbm [shape: f32[2,4,8,32], index: 7, kind: output, shape index: {}]  }
   0x1   :  { %13 = vsyncpa [#allocation8], 0 }
   0x2   :  { %14 = vsyncpa [#allocation5], 0 }
   0x3   :  { %16 = vsyncpa [#allocation5 + $0x1], 0  ;;  %s2100_s24 = smov 0   ;;  %s2102_s25 = smov 0  }
   0x4   :  { %s2104_s26 = smov 0   ;;  %s2106_s27 = smov 0  }
   0x5 LB: > { %s2121_s28 = sadd.s32 4294967295, %s2046_s27   ;;  %s1537_s29 = sadd.s32 4294967294, %s2046_s27   ;;  %s2046_s27 = sphi %s2106_s27, %s2526_s27   ;;  %s2042_s26 = sphi %s2104_s26, %s2525_s26   ;;  %s2038_s25 = sphi %s2102_s25, %s2524_s25   ;;  %s2034_s24 = sphi %s2100_s24, %s2523_s24  }
   0x6   : > { %s2125_s30 = sadd.s32 1, %s2046_s27   ;;  %s29_s8 = sadd.s32 1, %s2042_s26 }
   0x7   : > { %s26_s9 = ssub.s32 %s2046_s27, %s2125_s30  ;;  %p36_p0 = scmp.ne.s32.totalorder %s2042_s26, %s2038_s25 }
   0x8   : > { %p27_p1 = scmp.eq.s32.totalorder %s26_s9, 0  ;;  %p37_p2 = scmp.eq.s32.totalorder %s2046_s27, 0 }
   0x9   : > { %p197_p3 = scmp.eq.s32.totalorder %s2121_s28, 3  ;;  %p202_p4 = scmp.ne.s32.totalorder %s2038_s25, %s2034_s24 }
   0xa   : > { %s2137_s10 = scalar_select %p27_p1, %s2042_s26, %s29_s8  }
   0xb   : > { %p2139_p5 = por %p37_p2, %p36_p0  ;;  %p2143_p6 = por %p197_p3, %p36_p0 }
   0xc   : > { %p203_p7 = scmp.eq.s32.totalorder %s1537_s29, 3  ;;  %p1538_p8 = scmp.ge.s32.totalorder %s2046_s27, 1 }
   0xd   : > { %s2510_s11 = scalar_select %p2139_p5, 1, 0 }
   0xe   : > { %s2511_s12 = scalar_select %p2143_p6, 1, 0 }
   0xf   : > { %p210_p9 = scmp.lt.s32.totalorder %s2046_s27, 5  ;;  %p2149_p10 = por %p203_p7, %p202_p4 }
  0x10   : > { %p2507_p11 = scmp.eq.s32.totalorder %s2121_s28, 0  ;;  %s240_s17 = sshll.u32 %s2504_s5, 4  ;;  %s241_s17 = int_to_ptr.vmem [resolvable:$true] %s240_s17 }
  0x11   : > { %s2512_s13 = scalar_select %p2149_p10, 1, 0 }
  0x12   : > { %p2154_p12 = pnand %p1538_p8, %p210_p9  ;;  %s229_s20 = sshll.u32 %s2503_s4, 4  ;;  %s230_s20 = int_to_ptr.vmem [resolvable:$true] %s229_s20 }
  0x13   : > { %s251_s29 = sshll.u32 %s2505_s6, 4  ;;  %s1933_s8 = scalar_lea.vmem %s241_s17, 64  ;;  %s2175_s29 = int_to_ptr.vmem [resolvable:$true] %s251_s29 }
  0x14   : > { %s2513_s14 = scalar_select %p2154_p12, 1, 0 }
  0x15   : > { %p1822_p13 = pneg %p2154_p12  ;;  %p1934_p1 = scmp.ne.s32.totalorder %s241_s17, %s1933_s8 }
  0x16   : > { %p1941_p7 = scmp.lt.s32.totalorder %s241_s17, %s241_s17  ;;  %p1942_p8 = scmp.lt.s32.totalorder %s1933_s8, %s1933_s8 }
  0x17   : > { %p2168_p0 = pnand %p2507_p11, %p1822_p13 }
  0x18   : > { %p1943_p9 = por %p1942_p8, %p1941_p7 }
  0x19   : > { %p1935_p2 = pneg %p2168_p0 }
  0x1b   : > { %p1936_p3 = pnand %p1935_p2, %p1934_p1 }
  0x1d   : > { %p1937_p4 = pneg %p1936_p3 }
  0x1f   : > { %p1944_p13 = pnand %p1943_p9, %p1937_p4 }
  0x21   : > { %1947 = shalt.err (!%p1944_p13)
}
  0x22   : > { %s2048_s9 = smov [#allocation7]   ;;  %s1948_s15 = scalar_lea.vmem %s230_s20, 64 }
  0x23   : > { %1828 = dma.vmem_to_smem (!%p2168_p0), %s241_s17, 64, %s2048_s9, [#allocation8]  }
  0x24   : > { %p1949_p11 = scmp.ne.s32.totalorder %s230_s20, %s1948_s15  ;;  %p1956_p12 = scmp.lt.s32.totalorder %s230_s20, %s230_s20 }
  0x25   : > { %p1957_p5 = scmp.lt.s32.totalorder %s1948_s15, %s1948_s15 }
  0x26   : > { %p1951_p10 = pnand %p1949_p11, %p1935_p2 }
  0x27   : > { %p1958_p1 = por %p1957_p5, %p1956_p12 }
  0x28   : > { %p1952_p6 = pneg %p1951_p10 }
  0x2a   : > { %p1959_p3 = pnand %p1958_p1, %p1952_p6 }
  0x2c   : > { %1962 = shalt.err (!%p1959_p3)
}
  0x2d   : > { %s2049_s16 = smov [#allocation4]   ;;  %s1963_s17 = scalar_lea.vmem %s2175_s29, 64 }
  0x2e   : > { %1825 = dma.vmem_to_smem (!%p2168_p0), %s230_s20, 64, %s2049_s16, [#allocation6]  }
  0x2f   : > { %p1964_p4 = scmp.ne.s32.totalorder %s2175_s29, %s1963_s17  ;;  %p1971_p10 = scmp.lt.s32.totalorder %s2175_s29, %s2175_s29 }
  0x30   : > { %p1972_p8 = scmp.lt.s32.totalorder %s1963_s17, %s1963_s17 }
  0x31   : > { %p1966_p7 = pnand %p1964_p4, %p1935_p2 }
  0x32   : > { %p1973_p5 = por %p1972_p8, %p1971_p10 }
  0x33   : > { %p1967_p11 = pneg %p1966_p7 }
  0x35   : > { %p1974_p6 = pnand %p1973_p5, %p1967_p11 }
  0x37   : > { %1977 = shalt.err (!%p1974_p6)
}
  0x38   : > { %s2050_s18 = smov [#allocation9]   ;;  %p1542_p12 = scmp.ge.s32.totalorder %s2046_s27, 4 }
  0x39   : > { %1831 = dma.vmem_to_smem (!%p2168_p0), %s2175_s29, 64, %s2050_s18, [#allocation8]  }
  0x3a   : > { %258 = sbr.rel (%p1542_p12) target bundleno = 69 (0x45), region = 36  ;;  %p2515_p9 = scmp.ne.s32.totalorder (!%p1542_p12), %s2510_s11, 0 }
  0x3f   : > { %261 = sbr.rel (!%p2515_p9) target bundleno = 69 (0x45), region = 40  ;;  %s263_s19 = sand.u32 (%p2515_p9), 1, %s2042_s26  }
  0x40   : > { %s1544_s20 = sshll.u32 (%p2515_p9), %s2046_s27, 3  ;;  %s1543_s22 = sshll.u32 (%p2515_p9), %s263_s19, 4 }
  0x41   : > { %s267_s9 = scalar_lea.vmem (%p2515_p9), %s2499_s0, %s1544_s20  ;;  %s265_s21 = scalar_lea.vmem (%p2515_p9), [#allocation3], %s1543_s22 }
  0x42   : > { %v298_v0 = vld [vmem:[%s267_s9] sm:$0xff] (%p2515_p9) }
  0x43   : > { %v300_v1 = vld [vmem:[%s267_s9 + $0x20] sm:$0xff] (%p2515_p9)  ;;  %299 = vst [vmem:[%s265_s21] sm:$0xff] (%p2515_p9), %v298_v0 }
  0x44   : > { %301 = vst [vmem:[%s265_s21 + $0x8] sm:$0xff] %v300_v1 }
  0x45 PF: > { %p2516_p0 = scmp.ne.s32.totalorder %s2513_s14, 0 }
  0x46   : > { %s321_s11 = sand.u32 (!%p2516_p0), 1, %s2038_s25   ;;  %p2517_p2 = scmp.eq.s32.totalorder (!%p2516_p0), %s2121_s28, 0 }
  0x47   : > { %318 = sbr.rel (%p2516_p0) target bundleno = 734 (0x2de), region = 82  ;;  %s2212_s29 = sshll.u32 (!%p2516_p0), %s321_s11, 4 }
  0x48   : > { %s323_s15 = scalar_lea.vmem (!%p2516_p0), [#allocation3], %s2212_s29 }
  0x4c   : > { %2021 = dma.done.wait (%p2517_p2), [#allocation6], 64   ;;  %p2518_p13 = pmov %p2517_p2 }
  0x4d   : > { %p2519_p1 = pmov %p2517_p2 }
  0x4e   : > { %2023 = vsyncadd (%p2518_p13), [#allocation6], 4294967232 }
  0x4f   : > { %2025 = dma.done.wait (%p2519_p1), [#allocation8], 128   ;;  %p2520_p3 = pmov %p2519_p1 }
  0x51   : > { %2027 = vsyncadd (%p2520_p3), [#allocation8], 4294967168 }
  0x52   : > { %339 = sfence }
  0x53   : > { %v2223_v2 = vld [vmem:[%s323_s15] sm:$0xff]  ;;  %v2225_v3 = vld [vmem:[%s323_s15 + $0x8] sm:$0xff]  ;;  %s2228_s14 = sshll.u32 %s2121_s28, 7  ;;  %v2051_v5 = vmov 0.0   ;;  %vm2052_vm0 = vmmov 0   ;;  %p370_p4 = scmp.lt.s32.totalorder %s2121_s28, 3 }
  0x54   : > { %v1891_v4 = vld [vmem:[%s2501_s2 + $0x8] sm:$0xff]   ;;  %s462_s18 = sld [smem:[#allocation4 + %s2228_s14]]  ;;  %1704 = vmatprep.subr.bf16.mxu0 %v2051_v5  ;;  %v1892_v6 = vld [vmem:[%s2501_s2] sm:$0xff]   ;;  %1712 = vmatprep.subr.bf16.mxu1 %v2051_v5  ;;  %v459_v7 = vmul.f32 %v2223_v2, %v2223_v2  ;;  %v460_v8 = vmul.f32 %v2225_v3, %v2225_v3  ;;  %v378_v9 = vpack.c.bf16 %v2225_v3, %v2223_v2  ;;  %vm402_vm1 = vcmask 261120   ;;  %s605_s17 = sadd.s32 1, %s2228_s14 }
  0x55   : > { %s466_s22 = sld [smem:[#allocation7 + %s2228_s14]]  ;;  %1705 = vmatpush3.bf16.msra.mxu0 %v1891_v4  ;;  %1708 = vmatprep.mubr.msk.bf16.mxu0 %vm2052_vm0, %v2051_v5  ;;  %s2528_s28 = smov (!%p370_p4, %s2121_s28), 3  ;;  %vm497_vm2 = vcmask 1041409   ;;  %vm524_vm3 = vcmask 523264   ;;  %vm593_vm4 = vcmask 253952  }
  0x56   : > { %1706 = vmatprep.subr.bf16.mxu0 %v2051_v5  ;;  %1720 = vmatprep.mubr.msk.bf16.mxu1 %vm2052_vm0, %v2051_v5  ;;  %s1660_s23 = sshll.u32 %s2528_s28, 8  ;;  %s2053_s28 = smov 32  }
  0x57   : > { %s2257_s21 = scalar_lea.vmem %s2500_s1, %s1660_s23  ;;  %s606_s19 = sld [smem:[#allocation9 + %s605_s17]] }
  0x58   : > { %v1893_v14 = vld [vmem:[%s2257_s21 + $0x18] sm:$0xff]   ;;  %v1895_v18 = vld [vmem:[%s2257_s21 + $0x10] sm:$0xff]   ;;  %v1897_v21 = vld [vmem:[%s2257_s21 + $0x8] sm:$0xff]   ;;  %s714_s20 = sadd.s32 2, %s2228_s14  ;;  %s934_s9 = sadd.s32 4, %s2228_s14 }
  0x59   : > { %1707 = vmatpush3.bf16.msra.mxu0 %v1892_v6  ;;  %v1894_v17 = vld [vmem:[%s2257_s21 + $0x38] sm:$0xff]   ;;  %1713 = vmatpush3.bf16.msra.mxu1 %v1893_v14  ;;  %v1896_v20 = vld [vmem:[%s2257_s21 + $0x30] sm:$0xff]   ;;  %v1898_v22 = vld [vmem:[%s2257_s21 + $0x28] sm:$0xff]   ;;  %s715_s23 = sld [smem:[#allocation9 + %s714_s20]]  ;;  %s1154_s17 = sadd.s32 6, %s2228_s14 }
  0x5a   : > { %v463_v10 = vstv %s462_s18  ;;  %1724 = vmatprep.subr.bf16.mxu0 %v2051_v5  ;;  %1714 = vmatprep.subr.bf16.mxu1 %v2051_v5  ;;  %v1899_v23 = vld [vmem:[%s2257_s21] sm:$0xff]   ;;  %v1901_v38 = vld [vmem:[%s2257_s21 + $0x58] sm:$0xff]   ;;  %v1903_v42 = vld [vmem:[%s2257_s21 + $0x50] sm:$0xff]   ;;  %s490_s18 = sld [smem:[#allocation9 + %s2228_s14]]  ;;  %p2521_p11 = scmp.ne.s32.totalorder %s2511_s12, 0 }
  0x5b   : > { %v464_v11 = vmul.f32 %v463_v10, %v459_v7  ;;  %v465_v12 = vmul.f32 %v463_v10, %v460_v8  ;;  %v467_v13 = vstv %s466_s22  ;;  %v1900_v24 = vld [vmem:[%s2257_s21 + $0x20] sm:$0xff]   ;;  %v1902_v39 = vld [vmem:[%s2257_s21 + $0x78] sm:$0xff]   ;;  %v1904_v43 = vld [vmem:[%s2257_s21 + $0x70] sm:$0xff]   ;;  %s824_s22 = sadd.s32 3, %s2228_s14  ;;  %s935_s15 = sld [smem:[#allocation9 + %s934_s9]] }
  0x5c   : > { %1709 = vmatmul.mubr.msk.bf16.vlgmr.msra.gmra.mxu0 %vm402_vm1, %v378_v9  ;;  %v1905_v44 = vld [vmem:[%s2257_s21 + $0x48] sm:$0xff]   ;;  %v1907_v50 = vld [vmem:[%s2257_s21 + $0x40] sm:$0xff]   ;;  %v1909_v54 = vld [vmem:[%s2257_s21 + $0x98] sm:$0xff]   ;;  %s825_s8 = sld [smem:[#allocation9 + %s824_s22]]  ;;  %s369_s22 = scalar_lea.vmem [#allocation10], %s2212_s29 }
  0x5d   : > { %v468_v15 = vadd.f32 %v467_v13, %v464_v11  ;;  %v469_v16 = vadd.f32 %v467_v13, %v465_v12  ;;  %1732 = vmatprep.mubr.msk.bf16.mxu0 %vm2052_vm0, %v2051_v5  ;;  %1725 = vmatpush3.bf16.msra.mxu0 %v1894_v17  ;;  %v1906_v45 = vld [vmem:[%s2257_s21 + $0x68] sm:$0xff]   ;;  %v1908_v51 = vld [vmem:[%s2257_s21 + $0x60] sm:$0xff]   ;;  %v1910_v55 = vld [vmem:[%s2257_s21 + $0xb8] sm:$0xff]  }
  0x5e   : > { %1726 = vmatprep.subr.bf16.mxu0 %v2051_v5  ;;  %1715 = vmatpush3.bf16.msra.mxu1 %v1895_v18  ;;  %v1911_v58 = vld [vmem:[%s2257_s21 + $0x90] sm:$0xff]   ;;  %v1913_v60 = vld [vmem:[%s2257_s21 + $0x88] sm:$0xff]   ;;  %v1915_v4 = vld [vmem:[%s2257_s21 + $0x80] sm:$0xff]  }
  0x5f   : > { %v1886_v19 = vpack.i.bf16 %v469_v16, %v468_v15  ;;  %1716 = vmatprep.subr.bf16.mxu1 %v2051_v5  ;;  %v1912_v59 = vld [vmem:[%s2257_s21 + $0xb0] sm:$0xff]   ;;  %v1914_v61 = vld [vmem:[%s2257_s21 + $0xa8] sm:$0xff]   ;;  %v1916_v6 = vld [vmem:[%s2257_s21 + $0xa0] sm:$0xff]  }
  0x60   : > { %v1917_v9 = vld [vmem:[%s2257_s21 + $0xd8] sm:$0xff]   ;;  %v1919_v13 = vld [vmem:[%s2257_s21 + $0xd0] sm:$0xff]   ;;  %v1921_v15 = vld [vmem:[%s2257_s21 + $0xc8] sm:$0xff]  }
  0x61   : > { %1887 = vrot.lane.b32.xlu0 %v1886_v19, %s2053_s28  ;;  %1727 = vmatpush3.bf16.msra.mxu0 %v1896_v20  ;;  %v1918_v10 = vld [vmem:[%s2257_s21 + $0xf8] sm:$0xff]   ;;  %v1920_v14 = vld [vmem:[%s2257_s21 + $0xf0] sm:$0xff]   ;;  %v1922_v16 = vld [vmem:[%s2257_s21 + $0xe8] sm:$0xff]  }
  0x62   : > { %1728 = vmatprep.subr.bf16.mxu0 %v2051_v5  ;;  %1717 = vmatpush3.bf16.msra.mxu1 %v1897_v21  ;;  %v1923_v21 = vld [vmem:[%s2257_s21 + $0xc0] sm:$0xff]  }
  0x63   : > { %1718 = vmatprep.subr.bf16.mxu1 %v2051_v5 }
  0x65   : > { %1729 = vmatpush3.bf16.msra.mxu0 %v1898_v22  ;;  %v1924_v22 = vld [vmem:[%s2257_s21 + $0xe0] sm:$0xff]   ;;  %s1044_s21 = sadd.s32 5, %s2228_s14 }
  0x66   : > { %1730 = vmatprep.subr.bf16.mxu0 %v2051_v5  ;;  %1719 = vmatpush3.bf16.msra.mxu1 %v1899_v23  ;;  %s1045_s16 = sld [smem:[#allocation9 + %s1044_s21]]  ;;  %s2453_s21 = scalar_lea.hbm %s2506_s7, %s2228_s14 }
  0x67   : > { %1736 = vmatprep.subr.bf16.mxu1 %v2051_v5 }
  0x69   : > { %1731 = vmatpush3.bf16.msra.mxu0 %v1900_v24 }
  0x6a   : > { %1748 = vmatprep.subr.bf16.mxu0 %v2051_v5 }
  0xd3   : > { %v1888_v25 = vpop.permute.xlu0 %1887 }
  0xd4   : > { %v1890_v26 = vunpack.i.h.bf16 %v1888_v25  ;;  %v1889_v27 = vunpack.i.l.bf16 %v1888_v25 }
  0xd6   : > { %v479_v28 = vsel %vm402_vm1, %v2225_v3, %v1890_v26  ;;  %v478_v29 = vsel %vm402_vm1, %v2223_v2, %v1889_v27  ;;  %v1553_v27 = vld [vmem:[%s2502_s3] ss:$0 sm:$0xff] }
  0xd7   : > { %v481_v30 = vpack.c.bf16 %v479_v28, %v479_v28  ;;  %v480_v31 = vpack.c.bf16 %v478_v29, %v478_v29 }
  0xd9   : > { %v2283_v32 = vunpack.c.l.b16 %v481_v30  ;;  %v2285_v33 = vunpack.c.l.b16 %v480_v31 }
  0xdb   : > { %v496_v34 = vrot.slane %v2283_v32, 7  ;;  %v608_v35 = vrot.slane %v2285_v33, 1  ;;  %v717_v46 = vrot.slane %v2285_v33, 2  ;;  %v718_v47 = vrot.slane %v2283_v32, 1 }
  0xdc   : > { %v827_v48 = vrot.slane %v2285_v33, 3  ;;  %v828_v49 = vrot.slane %v2283_v32, 2  ;;  %v937_v62 = vrot.slane %v2285_v33, 4  ;;  %v938_v63 = vrot.slane %v2283_v32, 3 }
  0xdd   : > { %v498_v36 = vsel %vm497_vm2, %v496_v34, %v2285_v33  ;;  %v609_v37 = vsel %vm497_vm2, %v2283_v32, %v608_v35  ;;  %v719_v52 = vsel %vm497_vm2, %v718_v47, %v717_v46  ;;  %v1047_v0 = vrot.slane %v2285_v33, 5 }
  0xde   : > { %v499_v40 = vpack.c.b16 %v498_v36, %v498_v36  ;;  %v610_v41 = vpack.c.b16 %v609_v37, %v609_v37  ;;  %v829_v53 = vsel %vm497_vm2, %v828_v49, %v827_v48  ;;  %v720_v56 = vpack.c.b16 %v719_v52, %v719_v52 }
  0xdf   : > { %v830_v57 = vpack.c.b16 %v829_v53, %v829_v53  ;;  %v1048_v1 = vrot.slane %v2283_v32, 4  ;;  %v939_v7 = vsel %vm497_vm2, %v938_v63, %v937_v62  ;;  %v1157_v17 = vrot.slane %v2285_v33, 6 }
  0xe0   : > { %1721 = vmatmul.mubr.msk.bf16.vlgmr.msra.gmra.mxu1 %vm524_vm3, %v499_v40  ;;  %1733 = vmatmul.mubr.msk.bf16.vlgmr.msra.gmra.mxu0 %vm524_vm3, %v610_v41  ;;  %v940_v11 = vpack.c.b16 %v939_v7, %v939_v7  ;;  %v1158_v18 = vrot.slane %v2283_v32, 5  ;;  %v1267_v19 = vrot.slane %v2285_v33, 7  ;;  %v1268_v20 = vrot.slane %v2283_v32, 6 }
  0xe1   : > { %1737 = vmatpush3.bf16.msra.mxu1 %v1901_v38  ;;  %1749 = vmatpush3.bf16.msra.mxu0 %v1902_v39  ;;  %v1049_v8 = vsel %vm497_vm2, %v1048_v1, %v1047_v0  ;;  %v2054_v33 = vmov 1966171168   ;;  %v572_v35 = vlaneseq  ;;  %v491_v38 = vstv %s490_s18  ;;  %s1264_s18 = sadd.s32 7, %s2228_s14 }
  0xe2   : > { %1738 = vmatprep.subr.bf16.mxu1 %v2051_v5  ;;  %1750 = vmatprep.subr.bf16.mxu0 %v2051_v5  ;;  %v1050_v12 = vpack.c.b16 %v1049_v8, %v1049_v8  ;;  %v1159_v23 = vsel %vm497_vm2, %v1158_v18, %v1157_v17  ;;  %v1269_v24 = vsel %vm497_vm2, %v1268_v20, %v1267_v19  ;;  %v570_v34 = vunpack.c.l.s4 %v2054_v33  ;;  %s1265_s20 = sld [smem:[#allocation9 + %s1264_s18]] }
  0xe3   : > { %1744 = vmatprep.mubr.msk.bf16.mxu1 %vm2052_vm0, %v2051_v5  ;;  %1756 = vmatprep.mubr.msk.bf16.mxu0 %vm2052_vm0, %v2051_v5  ;;  %v1160_v25 = vpack.c.b16 %v1159_v23, %v1159_v23  ;;  %v1270_v26 = vpack.c.b16 %v1269_v24, %v1269_v24  ;;  %v573_v37 = vshrl.u32 %v572_v35, 7  ;;  %v607_v39 = vstv %s606_s19  ;;  %s1155_s19 = sld [smem:[#allocation9 + %s1154_s17]] }
  0xe4   : > { %v571_v36 = vunpack.c.0.s8 %v570_v34  ;;  %v936_v18 = vstv %s935_s15  ;;  %v1046_v19 = vstv %s1045_s16  ;;  %s2459_s15 = scalar_lea.sflag [#allocation5], %s321_s11  ;;  %s2056_s16 = smov [#allocation10]  }
  0xe5   : > { %1739 = vmatpush3.bf16.msra.mxu1 %v1903_v42  ;;  %1751 = vmatpush3.bf16.msra.mxu0 %v1904_v43  ;;  %s1982_s17 = sshll.u32 %s2056_s16, 4  ;;  %s1983_s17 = int_to_ptr.vmem [resolvable:$false] %s1982_s17 }
  0xe6   : > { %1740 = vmatprep.subr.bf16.mxu1 %v2051_v5  ;;  %1752 = vmatprep.subr.bf16.mxu0 %v2051_v5  ;;  %v2390_v40 = vsub.s32 %v571_v36, %v573_v37  ;;  %s1984_s18 = scalar_lea.vmem %s1983_s17, 512 }
  0xe9   : > { %1741 = vmatpush3.bf16.msra.mxu1 %v1905_v44  ;;  %1753 = vmatpush3.bf16.msra.mxu0 %v1906_v45 }
  0xea   : > { %1742 = vmatprep.subr.bf16.mxu1 %v2051_v5  ;;  %1754 = vmatprep.subr.bf16.mxu0 %v2051_v5 }
  0xed   : > { %1743 = vmatpush3.bf16.msra.mxu1 %v1907_v50  ;;  %1755 = vmatpush3.bf16.msra.mxu0 %v1908_v51 }
  0xee   : > { %1760 = vmatprep.subr.bf16.mxu1 %v2051_v5  ;;  %1772 = vmatprep.subr.bf16.mxu0 %v2051_v5 }
  0xf0   : > { %1745 = vmatmul.mubr.msk.bf16.vlgmr.msra.gmra.mxu1 %vm524_vm3, %v720_v56  ;;  %1757 = vmatmul.mubr.msk.bf16.vlgmr.msra.gmra.mxu0 %vm524_vm3, %v830_v57 }
  0xf1   : > { %1761 = vmatpush3.bf16.msra.mxu1 %v1909_v54  ;;  %1773 = vmatpush3.bf16.msra.mxu0 %v1910_v55 }
  0xf2   : > { %1762 = vmatprep.subr.bf16.mxu1 %v2051_v5  ;;  %1774 = vmatprep.subr.bf16.mxu0 %v2051_v5 }
  0xf3   : > { %1768 = vmatprep.mubr.msk.bf16.mxu1 %vm2052_vm0, %v2051_v5  ;;  %1780 = vmatprep.mubr.msk.bf16.mxu0 %vm2052_vm0, %v2051_v5 }
  0xf5   : > { %1763 = vmatpush3.bf16.msra.mxu1 %v1911_v58  ;;  %1775 = vmatpush3.bf16.msra.mxu0 %v1912_v59  ;;  %v716_v59 = vstv %s715_s23  ;;  %s1426_s23 = sshll.u32 %s369_s22, 4  ;;  %s2447_s23 = int_to_ptr.vmem [resolvable:$true] %s1426_s23 }
  0xf6   : > { %1764 = vmatprep.subr.bf16.mxu1 %v2051_v5  ;;  %1776 = vmatprep.subr.bf16.mxu0 %v2051_v5  ;;  %s1978_s29 = scalar_lea.vmem %s2447_s23, 256  ;;  %p1985_p5 = scmp.lt.s32.totalorder %s2447_s23, %s1983_s17 }
  0xf7   : > { %p1979_p7 = scmp.ne.s32.totalorder %s2447_s23, %s1978_s29  ;;  %p1986_p6 = scmp.lt.s32.totalorder %s1984_s18, %s1978_s29 }
  0xf9   : > { %1765 = vmatpush3.bf16.msra.mxu1 %v1913_v60  ;;  %1777 = vmatpush3.bf16.msra.mxu0 %v1914_v61  ;;  %v826_v60 = vstv %s825_s8  ;;  %p1980_p10 = pnand %p1979_p7, %p2521_p11  ;;  %p1987_p12 = por %p1986_p6, %p1985_p5 }
  0xfa   : > { %1766 = vmatprep.subr.bf16.mxu1 %v2051_v5  ;;  %1778 = vmatprep.subr.bf16.mxu0 %v2051_v5 }
  0xfb   : > { %p1981_p8 = pneg %p1980_p10 }
  0xfd   : > { %1767 = vmatpush3.bf16.msra.mxu1 %v1915_v4  ;;  %1779 = vmatpush3.bf16.msra.mxu0 %v1916_v6  ;;  %p1988_p9 = pnand %p1987_p12, %p1981_p8 }
  0xfe   : > { %1784 = vmatprep.subr.bf16.mxu1 %v2051_v5  ;;  %1796 = vmatprep.subr.bf16.mxu0 %v2051_v5 }
 0x100   : > { %1769 = vmatmul.mubr.msk.bf16.vlgmr.msra.gmra.mxu1 %vm524_vm3, %v940_v11  ;;  %1781 = vmatmul.mubr.msk.bf16.vlgmr.msra.gmra.mxu0 %vm524_vm3, %v1050_v12 }
 0x101   : > { %1785 = vmatpush3.bf16.msra.mxu1 %v1917_v9  ;;  %1797 = vmatpush3.bf16.msra.mxu0 %v1918_v10 }
 0x102   : > { %1786 = vmatprep.subr.bf16.mxu1 %v2051_v5  ;;  %1798 = vmatprep.subr.bf16.mxu0 %v2051_v5 }
 0x103   : > { %1792 = vmatprep.mubr.msk.bf16.mxu1 %vm2052_vm0, %v2051_v5  ;;  %1804 = vmatprep.mubr.msk.bf16.mxu0 %vm2052_vm0, %v2051_v5 }
 0x105   : > { %1787 = vmatpush3.bf16.msra.mxu1 %v1919_v13  ;;  %1799 = vmatpush3.bf16.msra.mxu0 %v1920_v14 }
 0x106   : > { %1788 = vmatprep.subr.bf16.mxu1 %v2051_v5  ;;  %1800 = vmatprep.subr.bf16.mxu0 %v2051_v5 }
 0x109   : > { %1789 = vmatpush3.bf16.msra.mxu1 %v1921_v15  ;;  %1801 = vmatpush3.bf16.msra.mxu0 %v1922_v16 }
 0x10a   : > { %1790 = vmatprep.subr.bf16.mxu1 %v2051_v5  ;;  %1802 = vmatprep.subr.bf16.mxu0 %v2051_v5 }
 0x10d   : > { %1791 = vmatpush3.bf16.msra.mxu1 %v1923_v21  ;;  %1803 = vmatpush3.bf16.msra.mxu0 %v1924_v22 }
 0x110   : > { %1793 = vmatmul.mubr.msk.bf16.vlgmr.msra.gmra.mxu1 %vm524_vm3, %v1160_v25  ;;  %1805 = vmatmul.mubr.msk.bf16.vlgmr.msra.gmra.mxu0 %vm524_vm3, %v1270_v26 }
 0x11c   : > { %v440_v28 = vpop.f32.mrf.mxu0 }
 0x11d   : > { %v2380_v5 = vadd.f32 %v1553_v27, %v440_v28 }
 0x11e   : > { %v1710_v29 = vpop.f32.mrf.mxu0 }
 0x11f   : > { %1383 = vrot.lane.b32.xlu1 %v2380_v5, %s2053_s28 }
 0x120   : > { %v443_v30 = vpop.f32.mrf.mxu0 }
 0x121   : > { %v2384_v31 = vadd.f32 %v1553_v27, %v443_v30 }
 0x122   : > { %v1711_v32 = vpop.f32.mrf.mxu0 }
 0x123   : > { %1385 = vrot.lane.b32.xlu0 %v2384_v31, %s2053_s28 }
 0x1a0   : > { %v562_v41 = vpop.f32.mrf.mxu1  ;;  %v672_v42 = vpop.f32.mrf.mxu0 }
 0x1a1   : > { %v563_v43 = vadd.f32 %v562_v41, %v491_v38  ;;  %v673_v44 = vadd.f32 %v672_v42, %v607_v39  ;;  %v1156_v39 = vstv %s1155_s19  ;;  %v1266_v41 = vstv %s1265_s20 }
 0x1a2   : > { %v1722_v45 = vpop.f32.mrf.mxu1  ;;  %v1734_v46 = vpop.f32.mrf.mxu0 }
 0x1a3   : > { %v575_v47 = vrot.slane %v563_v43, %v2390_v40  ;;  %v685_v48 = vrot.slane %v673_v44, %v2390_v40 }
 0x1a4   : > { %v565_v49 = vpop.f32.mrf.mxu1  ;;  %v675_v50 = vpop.f32.mrf.mxu0 }
 0x1a5   : > { %v576_v51 = vcombine.high %v575_v47, %v575_v47  ;;  %v583_v52 = vrot.slane %v575_v47, %v2390_v40  ;;  %v686_v53 = vcombine.high %v685_v48, %v685_v48  ;;  %v693_v54 = vrot.slane %v685_v48, %v2390_v40 }
 0x1a6   : > { %v1723_v55 = vpop.f32.mrf.mxu1  ;;  %v1735_v56 = vpop.f32.mrf.mxu0 }
 0x1a7   : > { %v590_v57 = vrot.slane %v576_v51, %v2390_v40  ;;  %594 = vst.msk [vmem:[#allocation2] sm:$0x1] %vm593_vm4, %v583_v52  ;;  %v700_v58 = vrot.slane %v686_v53, %v2390_v40  ;;  %703 = vst.msk [vmem:[#allocation2 + $0x1] sm:$0x1] %vm593_vm4, %v693_v54 }
 0x1a9   : > { %595 = vst.msk [vmem:[#allocation2 + $0x8] sm:$0x1] %vm593_vm4, %v590_v57  ;;  %704 = vst.msk [vmem:[#allocation2 + $0x9] sm:$0x1] %vm593_vm4, %v700_v58 }
 0x1b0   : > { %v782_v61 = vpop.f32.mrf.mxu1  ;;  %v892_v62 = vpop.f32.mrf.mxu0 }
 0x1b1   : > { %v783_v63 = vadd.f32 %v782_v61, %v716_v59  ;;  %v893_v0 = vadd.f32 %v892_v62, %v826_v60 }
 0x1b2   : > { %v1746_v1 = vpop.f32.mrf.mxu1  ;;  %v1758_v4 = vpop.f32.mrf.mxu0 }
 0x1b3   : > { %v795_v6 = vrot.slane %v783_v63, %v2390_v40  ;;  %v905_v7 = vrot.slane %v893_v0, %v2390_v40  ;;  %v1558_v0 = vmul.f32 -1.442695, %v2384_v31 }
 0x1b4   : > { %v785_v8 = vpop.f32.mrf.mxu1  ;;  %v895_v9 = vpop.f32.mrf.mxu0 }
 0x1b5   : > { %v796_v10 = vcombine.high %v795_v6, %v795_v6  ;;  %v803_v11 = vrot.slane %v795_v6, %v2390_v40  ;;  %v906_v12 = vcombine.high %v905_v7, %v905_v7  ;;  %v913_v13 = vrot.slane %v905_v7, %v2390_v40 }
 0x1b6   : > { %v1747_v14 = vpop.f32.mrf.mxu1  ;;  %v1759_v15 = vpop.f32.mrf.mxu0 }
 0x1b7   : > { %v810_v16 = vrot.slane %v796_v10, %v2390_v40  ;;  %813 = vst.msk [vmem:[#allocation2 + $0x2] sm:$0x1] %vm593_vm4, %v803_v11  ;;  %v920_v17 = vrot.slane %v906_v12, %v2390_v40  ;;  %923 = vst.msk [vmem:[#allocation2 + $0x3] sm:$0x1] %vm593_vm4, %v913_v13  ;;  %v1386_v10 = vpop.permute.xlu0 %1385  ;;  %v1384_v11 = vpop.permute.xlu1 %1383 }
 0x1b9   : > { %814 = vst.msk [vmem:[#allocation2 + $0xa] sm:$0x1] %vm593_vm4, %v810_v16  ;;  %924 = vst.msk [vmem:[#allocation2 + $0xb] sm:$0x1] %vm593_vm4, %v920_v17 }
 0x1c0   : > { %v1002_v20 = vpop.f32.mrf.mxu1  ;;  %v1112_v21 = vpop.f32.mrf.mxu0 }
 0x1c1   : > { %v1003_v22 = vadd.f32 %v1002_v20, %v936_v18  ;;  %v1113_v23 = vadd.f32 %v1112_v21, %v1046_v19 }
 0x1c2   : > { %v1770_v24 = vpop.f32.mrf.mxu1  ;;  %v1782_v25 = vpop.f32.mrf.mxu0 }
 0x1c3   : > { %v1015_v26 = vrot.slane %v1003_v22, %v2390_v40  ;;  %v1125_v27 = vrot.slane %v1113_v23, %v2390_v40 }
 0x1c4   : > { %v1005_v28 = vpop.f32.mrf.mxu1  ;;  %v1115_v29 = vpop.f32.mrf.mxu0 }
 0x1c5   : > { %v1016_v30 = vcombine.high %v1015_v26, %v1015_v26  ;;  %v1023_v32 = vrot.slane %v1015_v26, %v2390_v40  ;;  %v1126_v33 = vcombine.high %v1125_v27, %v1125_v27  ;;  %v1133_v34 = vrot.slane %v1125_v27, %v2390_v40 }
 0x1c6   : > { %v1771_v35 = vpop.f32.mrf.mxu1  ;;  %v1783_v36 = vpop.f32.mrf.mxu0 }
 0x1c7   : > { %v1030_v37 = vrot.slane %v1016_v30, %v2390_v40  ;;  %1033 = vst.msk [vmem:[#allocation2 + $0x4] sm:$0x1] %vm593_vm4, %v1023_v32  ;;  %v1140_v38 = vrot.slane %v1126_v33, %v2390_v40  ;;  %1143 = vst.msk [vmem:[#allocation2 + $0x5] sm:$0x1] %vm593_vm4, %v1133_v34 }
 0x1c9   : > { %1034 = vst.msk [vmem:[#allocation2 + $0xc] sm:$0x1] %vm593_vm4, %v1030_v37  ;;  %1144 = vst.msk [vmem:[#allocation2 + $0xd] sm:$0x1] %vm593_vm4, %v1140_v38 }
 0x1d0   : > { %v1222_v42 = vpop.f32.mrf.mxu1  ;;  %v1332_v43 = vpop.f32.mrf.mxu0 }
 0x1d1   : > { %v1223_v44 = vadd.f32 %v1222_v42, %v1156_v39  ;;  %v1333_v45 = vadd.f32 %v1332_v43, %v1266_v41 }
 0x1d2   : > { %v1794_v46 = vpop.f32.mrf.mxu1  ;;  %v1806_v47 = vpop.f32.mrf.mxu0 }
 0x1d3   : > { %v1235_v48 = vrot.slane %v1223_v44, %v2390_v40  ;;  %v1345_v49 = vrot.slane %v1333_v45, %v2390_v40 }
 0x1d4   : > { %v1225_v50 = vpop.f32.mrf.mxu1  ;;  %v1335_v51 = vpop.f32.mrf.mxu0 }
 0x1d5   : > { %v1236_v52 = vcombine.high %v1235_v48, %v1235_v48  ;;  %v1243_v53 = vrot.slane %v1235_v48, %v2390_v40  ;;  %v1346_v54 = vcombine.high %v1345_v49, %v1345_v49  ;;  %v1353_v55 = vrot.slane %v1345_v49, %v2390_v40 }
 0x1d6   : > { %v1795_v56 = vpop.f32.mrf.mxu1  ;;  %v1807_v57 = vpop.f32.mrf.mxu0 }
 0x1d7   : > { %v1250_v58 = vrot.slane %v1236_v52, %v2390_v40  ;;  %1253 = vst.msk [vmem:[#allocation2 + $0x6] sm:$0x1] %vm593_vm4, %v1243_v53  ;;  %v1360_v59 = vrot.slane %v1346_v54, %v2390_v40  ;;  %1363 = vst.msk [vmem:[#allocation2 + $0x7] sm:$0x1] %vm593_vm4, %v1353_v55  ;;  %v1557_v40 = vmul.f32 -1.442695, %v2380_v5 }
 0x1d9   : > { %1254 = vst.msk [vmem:[#allocation2 + $0xe] sm:$0x1] %vm593_vm4, %v1250_v58  ;;  %1364 = vst.msk [vmem:[#allocation2 + $0xf] sm:$0x1] %vm593_vm4, %v1360_v59  ;;  %1925 = vpow2.f32 %v1557_v40 }
 0x1da   : > { %1927 = vpow2.f32 %v1558_v0 }
 0x1de   : > { %v1365_v60 = vld [vmem:[#allocation2] sm:$0xff] }
 0x1df   : > { %v1367_v61 = vmul.f32 0.125, %v1365_v60 }
 0x1e0   : > { %v1366_v62 = vld [vmem:[#allocation2 + $0x8] sm:$0xff] }
 0x1e1   : > { %1371 = vrot.lane.b32.xlu0 %v1367_v61, %s2053_s28  ;;  %v1368_v63 = vmul.f32 0.125, %v1366_v62 }
 0x1e3   : > { %1373 = vrot.lane.b32.xlu1 %v1368_v63, %s2053_s28 }
 0x1e5   : > { %1397 = vrot.lane.b32.xlu0 %v2225_v3, %s2053_s28 }
 0x1e6   : > { %v1926_v1 = vpop.eup %1925 }
 0x1e7   : > { %1395 = vrot.lane.b32.xlu1 %v2223_v2, %s2053_s28  ;;  %v1928_v4 = vpop.eup %1927  ;;  %v453_v6 = vadd.f32 1.0, %v1926_v1  ;;  %s2055_s28 = smov 96  }
 0x1e8   : > { %v454_v7 = vadd.f32 1.0, %v1928_v4 }
 0x1e9   : > { %1929 = vrcp.f32 %v453_v6 }
 0x1ea   : > { %1931 = vrcp.f32 %v454_v7 }
 0x1f6   : > { %v1930_v8 = vpop.eup %1929 }
 0x1f7   : > { %v1932_v9 = vpop.eup %1931  ;;  %v1379_v3 = vsub.f32 1.0, %v1930_v8 }
 0x1f8   : > { %v1380_v12 = vsub.f32 1.0, %v1932_v9 }
 0x1f9   : > { %v1389_v31 = vmul.f32 %v1384_v11, %v1379_v3 }
 0x1fa   : > { %v1390_v14 = vmul.f32 %v1386_v10, %v1380_v12 }
 0x253   : > { %v1372_v2 = vpop.permute.xlu0 %1371 }
 0x254   : > { %v1377_v13 = vmul.f32 %v1930_v8, %v1372_v2 }
 0x255   : > { %v1374_v5 = vpop.permute.xlu1 %1373 }
 0x256   : > { %v1378_v15 = vmul.f32 %v1932_v9, %v1374_v5  ;;  %v1391_v18 = vadd.f32 %v1389_v31, %v1377_v13 }
 0x257   : > { %v1398_v16 = vpop.permute.xlu0 %1397 }
 0x258   : > { %v1392_v17 = vadd.f32 %v1390_v14, %v1378_v15 }
 0x259   : > { %v1396_v19 = vpop.permute.xlu1 %1395 }
 0x25a   : > { %v1402_v20 = vadd.f32 %v1398_v16, %v1392_v17  ;;  %v1401_v21 = vadd.f32 %v1396_v19, %v1391_v18 }
 0x25c   : > { %1407 = vrot.lane.b32.xlu0 %v1402_v20, %s2055_s28  ;;  %1405 = vrot.lane.b32.xlu1 %v1401_v21, %s2055_s28 }
 0x2ce   : > { %v1408_v22 = vpop.permute.xlu0 %1407  ;;  %v1406_v23 = vpop.permute.xlu1 %1405 }
 0x2cf   : > { %1412 = vst.msk [vmem:[%s369_s22 + $0x8] sm:$0xff] %vm402_vm1, %v1408_v22  ;;  %1411 = vst.msk [vmem:[%s369_s22] sm:$0xff] %vm402_vm1, %v1406_v23 }
 0x2d0   : > { %1991 = shalt.err (!%p1988_p9)
}
 0x2d1   : > { %s1992_s11 = scalar_lea.hbm %s2453_s21, 256  ;;  %s1996_s20 = scalar_lea.hbm %s2506_s7, 1024 }
 0x2d2   : > { %p1993_p0 = scmp.ne.s32.totalorder %s2453_s21, %s1992_s11  ;;  %p1997_p1 = scmp.lt.s32.totalorder %s2453_s21, %s2506_s7 }
 0x2d3   : > { %p1998_p3 = scmp.lt.s32.totalorder %s1996_s20, %s1992_s11 }
 0x2d4   : > { %p1994_p2 = pnand %p1993_p0, %p2521_p11 }
 0x2d5   : > { %p1999_p4 = por %p1998_p3, %p1997_p1 }
 0x2d6   : > { %p1995_p13 = pneg %p1994_p2 }
 0x2d8   : > { %p2000_p7 = pnand %p1999_p4, %p1995_p13 }
 0x2da   : > { %2003 = shalt.err (!%p2000_p7)
}
 0x2db   : > { %s2057_s8 = smov 128   ;;  %s2058_s9 = smov 512  }
 0x2dc   : > { %s2059_s29 = smov 8  }
 0x2dd   : > { %1820 = dma.vmem_to_hbm [thread:$0]  (%p2521_p11), %s2447_s23, 256, %s2453_s21, %s2459_s15, %s2057_s8, %s2058_s9, %s2059_s29  }
 0x2de PF: > { %p1842_p10 = scmp.ge.s32.totalorder %s2046_s27, 2  ;;  %s1441_s16 = sand.u32 1, %s2034_s24  }
 0x2df   : > { %p2522_p8 = scmp.ne.s32.totalorder %s2512_s13, 0  ;;  %s1442_s17 = scalar_lea.sflag [#allocation5], %s1441_s16 }
 0x2e1   : > { %p1833_p5 = pnand %p1842_p10, %p2522_p8 }
 0x2e3   : > { %p1834_p6 = pneg %p1833_p5 }
 0x2e5   : > { %2029 = dma.done.wait (%p1834_p6), %s1442_s17, 256  }
 0x2e6   : > { %2031 = vsyncadd (%p1834_p6), %s1442_s17, 4294967040  ;;  %p19_p12 = scmp.ge.s32.totalorder %s2125_s30, 6   ;;  %s2523_s24 = smov %s2038_s25 }
 0x2e7   : > { %s2524_s25 = smov %s2042_s26  ;;  %s2525_s26 = smov %s2137_s10 }
 0x2e8   : > { %s2526_s27 = smov %s2125_s30  ;;  %21 = sbr.rel (!%p19_p12) target bundleno = 5 (0x5), region = 149 }
 0x2ed   :  { %1447 = vsyncpa [#allocation5], 1 }
 0x2ee   :  { %1449 = vsyncpa [#allocation5 + $0x1], 1 }
 0x2ef   :  { %1450 = vsyncpa [#allocation6], 1 }
 0x2f0   :  { %1452 = vsyncpa [#allocation6 + $0x1], 1 }
 0x2f1   :  { %1453 = vsyncpa [#allocation8], 1 }

</bundles_post_ra>
